<compile_context>
chip_gen: v7x
topology: tpu7x:2x2x1
jax: 0.10.0
libtpu: 0.0.40
codegen_flags: <defaults>
</compile_context>

<pallas_src>
import functools
import math

import jax
import jax.numpy as jnp
from jax.experimental import pallas as pl
from jax.experimental.pallas import tpu as pltpu


# ----------------------------------------------------------------------------
# GELU (tanh approximation, matches nn.GELU(approximate='tanh')), f32.
# Folded constants: inner = h*(k0 + k1*h^2)  ==  k0*h*(1 + 0.044715*h^2).
_GELU_K0 = 0.7978845608028654              # sqrt(2/pi)
_GELU_K1 = 0.7978845608028654 * 0.044715   # folded


def _gelu_tanh(h):
    inner = h * (_GELU_K0 + _GELU_K1 * (h * h))
    return 0.5 * h * (1.0 + jnp.tanh(inner))


# ----------------------------------------------------------------------------
# Kernel bodies.
def _mlp_resident_kernel(x_ref, w1_ref, b1_ref, w2_ref, b2_ref, o_ref, *, cdt):
    """Weights fully resident in VMEM; single (row-tile) grid axis."""
    x = x_ref[...].astype(cdt)                      # in-kernel cast (no wrapper pass)
    h = jnp.dot(x, w1_ref[...].astype(cdt),
                preferred_element_type=jnp.float32)
    h = h + b1_ref[...]                             # (1, H) broadcasts over rows
    g = _gelu_tanh(h)                               # f32 GELU (bf16 possible on v6e/v7x)
    y = jnp.dot(g.astype(cdt), w2_ref[...].astype(cdt),
                preferred_element_type=jnp.float32)
    o_ref[...] = (y + b2_ref[...]).astype(o_ref.dtype)


def _mlp_streamed_f32out_kernel(x_ref, w1_ref, b1_ref, w2_ref, b2_ref, o_ref,
                                *, cdt):
    """Hidden dim streamed; f32 output block doubles as the accumulator."""
    h_idx = pl.program_id(1)
    x = x_ref[...].astype(cdt)
    h = jnp.dot(x, w1_ref[...].astype(cdt),
                preferred_element_type=jnp.float32) + b1_ref[...]
    g = _gelu_tanh(h)
    part = jnp.dot(g.astype(cdt), w2_ref[...].astype(cdt),
                   preferred_element_type=jnp.float32)

    @pl.when(h_idx == 0)
    def _init():
        o_ref[...] = part + b2_ref[...]

    @pl.when(h_idx > 0)
    def _acc():
        o_ref[...] += part


def _mlp_streamed_scratch_kernel(x_ref, w1_ref, b1_ref, w2_ref, b2_ref, o_ref,
                                 acc_ref, *, cdt):
    """Hidden dim streamed; f32 scratch accumulator (for non-f32 outputs)."""
    h_idx = pl.program_id(1)

    @pl.when(h_idx == 0)
    def _init():
        acc_ref[...] = jnp.zeros_like(acc_ref)

    x = x_ref[...].astype(cdt)
    h = jnp.dot(x, w1_ref[...].astype(cdt),
                preferred_element_type=jnp.float32) + b1_ref[...]
    g = _gelu_tanh(h)
    acc_ref[...] += jnp.dot(g.astype(cdt), w2_ref[...].astype(cdt),
                            preferred_element_type=jnp.float32)

    @pl.when(h_idx == pl.num_programs(1) - 1)
    def _finalize():
        o_ref[...] = (acc_ref[...] + b2_ref[...]).astype(o_ref.dtype)


# ----------------------------------------------------------------------------
# Host-side helpers.
def _chip_generation():
    try:
        kind = jax.devices()[0].device_kind.lower()
    except Exception:
        return 0
    for g in (7, 6, 5, 4):
        if (f"v{g}" in kind) or (f"tpu{g}" in kind) or (f"tpu {g}" in kind):
            return g
    return 0


def _vmem_capacity_bytes():
    try:
        info = pltpu.get_tpu_info()
        for attr in ("vmem_capacity_bytes", "vmem_size_bytes", "vmem_bytes"):
            cap = getattr(info, attr, None)
            if cap:
                return int(cap)
    except Exception:
        pass
    return 64 << 20  # conservative (v7x-sized) fallback


def _pick_row_tile(m, target, align, prefer_even_tiles=False):
    cands = [t for t in range(align, min(target, m) + 1, align) if m % t == 0]
    if not cands:
        return m
    if prefer_even_tiles:
        even = [t for t in cands if (m // t) % 2 == 0]
        if even:
            return max(even)
    return max(cands)


# ----------------------------------------------------------------------------
def mlp_pallas(x, w1, b1, w2, b2, *, tm=None, th=None,
               compute_dtype=jnp.bfloat16):
    """GPT-2 MLP forward: gelu_tanh(x @ W1 + b1) @ W2 + b2.

    x : (B, T, E); w1: (E, 4E); b1: (4E,); w2: (4E, E); b2: (E,).
    tm : row tile over flattened B*T (primary perf knob; default per chip:
         v6e 768, v7x 512, v5e 256).
    th : hidden-dim tile; pass th < 4E to force the streamed path, otherwise
         the wrapper keeps the weights fully VMEM-resident when they fit.
    compute_dtype : MXU operand dtype (bf16 default; f32 is the debug path).
         Accumulation, biases and GELU are always f32; output keeps x.dtype.
    Weights should be stored persistently in compute_dtype (cast hoisted out
    of the per-call path); otherwise the kernel casts the tile in VMEM.
    """
    B, T, E = x.shape
    H = w1.shape[1]
    assert w1.shape == (E, H) and w2.shape == (H, E)
    assert b1.shape == (H,) and b2.shape == (E,)
    M = B * T

    out_dtype = x.dtype
    cdt = jnp.dtype(compute_dtype)
    gen = _chip_generation()
    multi_core = (gen == 7)                      # v7x: 2 TensorCores / chip

    xb = jnp.dtype(x.dtype).itemsize
    ob = jnp.dtype(out_dtype).itemsize
    w1b = jnp.dtype(w1.dtype).itemsize
    w2b = jnp.dtype(w2.dtype).itemsize

    # ---- row tile -----------------------------------------------------------
    row_align = 16 if cdt.itemsize < 4 else 8    # bf16 sublane packing
    if tm is None:
        tm = {5: 256, 6: 768, 7: 512}.get(gen, 512)
    tm = _pick_row_tile(M, tm, row_align, prefer_even_tiles=multi_core)
    n_rows = M // tm

    # ---- VMEM budget (per-generation, never above physical) ----------------
    vmem_cap = _vmem_capacity_bytes()
    budget = int(0.80 * vmem_cap)

    x2 = x.reshape(M, E)                         # reshape only, NO dtype cast
    b1_2 = b1.reshape(1, H).astype(jnp.float32)
    b2_2 = b2.reshape(1, E).astype(jnp.float32)

    bias_bytes = 2 * 8 * H * 4 + 2 * 8 * max(E, 128) * 4   # sublane-padded
    io_bytes = 2 * tm * E * xb + 2 * tm * E * ob

    # Resident-path footprint (conservatively assume double-buffered weights
    # plus a cast temporary if the stored weight dtype != compute dtype).
    cast_extra = 0
    if jnp.dtype(w1.dtype) != cdt:
        cast_extra += E * H * cdt.itemsize
    if jnp.dtype(w2.dtype) != cdt:
        cast_extra += H * E * cdt.itemsize
    est_res = io_bytes + 2 * E * H * w1b + 2 * H * E * w2b + bias_bytes + cast_extra

    force_streamed = (th is not None) and (th < H)
    use_resident = (not force_streamed) and (est_res <= budget)

    if use_resident:
        kernel = functools.partial(_mlp_resident_kernel, cdt=cdt)
        vmem_limit = min(max(int(1.2 * est_res) + (1 << 20), 32 << 20), budget)
        cost = pl.CostEstimate(
            flops=4 * M * E * H,                     # two matmuls, 2*M*E*H each
            transcendentals=M * H,                   # one tanh per hidden act
            bytes_accessed=int(M * E * xb + E * H * w1b + H * E * w2b
                               + H * 4 + E * 4 + M * E * ob))
        out2 = pl.pallas_call(
            kernel,
            out_shape=jax.ShapeDtypeStruct((M, E), out_dtype),
            grid_spec=pltpu.PrefetchScalarGridSpec(
                num_scalar_prefetch=0,
                grid=(n_rows,),
                in_specs=[
                    pl.BlockSpec((tm, E), lambda i: (i, 0)),   # x rows
                    pl.BlockSpec((E, H), lambda i: (0, 0)),    # W1 (resident)
                    pl.BlockSpec((1, H), lambda i: (0, 0)),    # b1
                    pl.BlockSpec((H, E), lambda i: (0, 0)),    # W2 (resident)
                    pl.BlockSpec((1, E), lambda i: (0, 0)),    # b2
                ],
                out_specs=pl.BlockSpec((tm, E), lambda i: (i, 0)),
            ),
            compiler_params=pltpu.CompilerParams(
                dimension_semantics=("parallel",),
                vmem_limit_bytes=vmem_limit),
            cost_estimate=cost,
        )(x2, w1, b1_2, w2, b2_2)
        return out2.reshape(B, T, E)

    # ---- hidden-streamed path ----------------------------------------------
    th_align = 128 if gen == 5 else 256
    acc_bytes = 0 if out_dtype == jnp.float32 else tm * E * 4

    def _streamed_est(tcur):
        return (io_bytes + 2 * E * tcur * w1b + 2 * tcur * E * w2b
                + 2 * 8 * tcur * 4 + 2 * 8 * max(E, 128) * 4 + acc_bytes)

    if th is not None:
        assert H % th == 0 and (th % 128 == 0 or th == H), "bad hidden tile"
        th_sel = th
    else:
        th_target = 1024 if gen != 5 else 512
        divisors = [d for d in range(th_align, H + 1, th_align) if H % d == 0]
        if not divisors:
            divisors = [d for d in range(128, H + 1, 128) if H % d == 0] or [H]
        fitting = [d for d in divisors
                   if d <= th_target and _streamed_est(d) <= budget]
        th_sel = max(fitting) if fitting else min(divisors)

    n_h = H // th_sel
    est_str = _streamed_est(th_sel)
    vmem_limit = min(max(int(1.25 * est_str) + (1 << 20), 32 << 20), budget)

    if out_dtype == jnp.float32:
        kernel = functools.partial(_mlp_streamed_f32out_kernel, cdt=cdt)
        scratch = []
    else:
        kernel = functools.partial(_mlp_streamed_scratch_kernel, cdt=cdt)
        scratch = [pltpu.VMEM((tm, E), jnp.float32)]

    cost = pl.CostEstimate(
        flops=4 * M * E * H,
        transcendentals=M * H,
        bytes_accessed=int(M * E * xb
                           + n_rows * (E * H * w1b + H * E * w2b)  # re-streamed
                           + H * 4 + E * 4 + M * E * ob))

    out2 = pl.pallas_call(
        kernel,
        out_shape=jax.ShapeDtypeStruct((M, E), out_dtype),
        grid_spec=pltpu.PrefetchScalarGridSpec(
            num_scalar_prefetch=0,
            grid=(n_rows, n_h),                       # reduction axis last
            in_specs=[
                pl.BlockSpec((tm, E), lambda i, h: (i, 0)),   # x rows (resident over h)
                pl.BlockSpec((E, th_sel), lambda i, h: (0, h)),  # W1 slice
                pl.BlockSpec((1, th_sel), lambda i, h: (0, h)),  # b1 slice
                pl.BlockSpec((th_sel, E), lambda i, h: (h, 0)),  # W2 slice
                pl.BlockSpec((1, E), lambda i, h: (0, 0)),       # b2
            ],
            out_specs=pl.BlockSpec((tm, E), lambda i, h: (i, 0)),
            scratch_shapes=scratch,
        ),
        compiler_params=pltpu.CompilerParams(
            dimension_semantics=("parallel", "arbitrary"),
            vmem_limit_bytes=vmem_limit),
        cost_estimate=cost,
    )(x2, w1, b1_2, w2, b2_2)

    return out2.reshape(B, T, E)


# ----------------------------------------------------------------------------
def mlp_reference(x, w1, b1, w2, b2):
    h = jnp.einsum("bte,eh->bth", x, w1) + b1
    g = 0.5 * h * (1.0 + jnp.tanh(_GELU_K0 * (h + 0.044715 * h ** 3)))
    return jnp.einsum("bth,he->bte", g, w2) + b2


if __name__ == "__main__":
    # Small GPT-2-like config with a lane-dense feature dim: n_embd=128 -> hidden=512.
    B, T, E = 2, 8, 128
    H = 4 * E

    key = jax.random.PRNGKey(0)
    kx, kw1, kb1, kw2, kb2 = jax.random.split(key, 5)

    x = jax.random.normal(kx, (B, T, E), dtype=jnp.float32)
    w1 = jax.random.normal(kw1, (E, H), dtype=jnp.float32) * (1.0 / math.sqrt(E))
    b1 = jax.random.normal(kb1, (H,), dtype=jnp.float32) * 0.5
    w2 = jax.random.normal(kw2, (H, E), dtype=jnp.float32) * (1.0 / math.sqrt(H))
    b2 = jax.random.normal(kb2, (E,), dtype=jnp.float32) * 0.5

    ref = mlp_reference(x, w1, b1, w2, b2)

    # 1) f32 debug/reference path (weight-resident, single grid axis).
    out_f32 = mlp_pallas(x, w1, b1, w2, b2, compute_dtype=jnp.float32)
    jax.block_until_ready(out_f32)
    assert out_f32.shape == (B, T, E)
    err = float(jnp.max(jnp.abs(out_f32 - ref)))
    assert err < 1e-2, f"f32 resident path mismatch: {err}"

    # 2) Default bf16 MXU-operand path; weights stored persistently in bf16
    #    (cast hoisted out of the per-call path, per the perf feedback).
    w1_bf16 = w1.astype(jnp.bfloat16)
    w2_bf16 = w2.astype(jnp.bfloat16)
    out_bf16 = mlp_pallas(x, w1_bf16, b1, w2_bf16, b2)   # compute_dtype=bf16 default
    jax.block_until_ready(out_bf16)
    assert out_bf16.shape == (B, T, E)
    assert bool(jnp.all(jnp.isfinite(out_bf16)))
    err = float(jnp.max(jnp.abs(out_bf16 - ref)))
    assert err < 0.35, f"bf16 resident path diverged: {err}"

    # 3) Hidden-streamed path (th < H forces the accumulate-over-h grid);
    #    f32 output accumulates directly into the resident output block.
    out_stream = mlp_pallas(x, w1, b1, w2, b2, th=128, compute_dtype=jnp.float32)
    jax.block_until_ready(out_stream)
    err = float(jnp.max(jnp.abs(out_stream - ref)))
    assert err < 1e-2, f"f32 streamed path mismatch: {err}"

    # 4) Streamed path with bf16 input/output (exercises the f32 scratch
    #    accumulator variant).
    x_bf16 = x.astype(jnp.bfloat16)
    out_sb = mlp_pallas(x_bf16, w1_bf16, b1, w2_bf16, b2, th=256)
    jax.block_until_ready(out_sb)
    assert out_sb.dtype == jnp.bfloat16
    err = float(jnp.max(jnp.abs(out_sb.astype(jnp.float32) - ref)))
    assert err < 0.5, f"bf16 streamed path diverged: {err}"

    print("KERNEL_OK")
</pallas_src>

<mosaic_0001>
module attributes {stable_mosaic.version = 11 : i64} {
  func.func @_mlp_resident_kernel(%arg0: i32, %arg1: memref<16x128xf32, #tpu.memory_space<vmem>>, %arg2: memref<128x512xf32, #tpu.memory_space<vmem>>, %arg3: memref<1x512xf32, #tpu.memory_space<vmem>>, %arg4: memref<512x128xf32, #tpu.memory_space<vmem>>, %arg5: memref<1x128xf32, #tpu.memory_space<vmem>>, %arg6: memref<16x128xf32, #tpu.memory_space<vmem>>) attributes {dimension_semantics = [#tpu.dimension_semantics<parallel>], iteration_bounds = array<i64: 1>, scalar_prefetch = 0 : i64, scratch_operands = 0 : i64, tpu.core_type = #tpu.core_type<tc>, window_params = [{transform_indices = @transform_0, window_bounds = array<i64: 16, 128>}, {pipeline_mode = #tpu.pipeline_mode<synchronous>, transform_indices = @transform_1, window_bounds = array<i64: 128, 512>}, {pipeline_mode = #tpu.pipeline_mode<synchronous>, transform_indices = @transform_2, window_bounds = array<i64: 1, 512>}, {pipeline_mode = #tpu.pipeline_mode<synchronous>, transform_indices = @transform_3, window_bounds = array<i64: 512, 128>}, {pipeline_mode = #tpu.pipeline_mode<synchronous>, transform_indices = @transform_4, window_bounds = array<i64: 1, 128>}, {transform_indices = @transform_5, window_bounds = array<i64: 16, 128>}]} {
    %c0 = arith.constant 0 : index
    %c0_0 = arith.constant 0 : index
    %0 = vector.load %arg1[%c0, %c0_0] : memref<16x128xf32, #tpu.memory_space<vmem>>, vector<16x128xf32>
    %c0_1 = arith.constant 0 : index
    %c0_2 = arith.constant 0 : index
    %1 = vector.load %arg2[%c0_1, %c0_2] : memref<128x512xf32, #tpu.memory_space<vmem>>, vector<128x512xf32>
    %cst = arith.constant dense<0.000000e+00> : vector<16x512xf32>
    %2 = tpu.matmul %0, %1, %cst {dimension_numbers = #tpu.dot_dimension_numbers<[1], [0], [0], [1], [0, 0, 1, 1], [], []>} : vector<16x128xf32>, vector<128x512xf32>, vector<16x512xf32> -> vector<16x512xf32>
    %c0_3 = arith.constant 0 : index
    %c0_4 = arith.constant 0 : index
    %3 = vector.load %arg3[%c0_3, %c0_4] : memref<1x512xf32, #tpu.memory_space<vmem>>, vector<1x512xf32>
    %4 = vector.broadcast %3 : vector<1x512xf32> to vector<16x512xf32>
    %5 = arith.addf %2, %4 : vector<16x512xf32>
    %6 = arith.mulf %5, %5 : vector<16x512xf32>
    %cst_5 = arith.constant 0.0356774069 : f32
    %7 = vector.broadcast %cst_5 : f32 to vector<16x512xf32>
    %8 = arith.mulf %7, %6 : vector<16x512xf32>
    %cst_6 = arith.constant 0.797884583 : f32
    %9 = vector.broadcast %cst_6 : f32 to vector<16x512xf32>
    %10 = arith.addf %9, %8 : vector<16x512xf32>
    %11 = arith.mulf %5, %10 : vector<16x512xf32>
    %cst_7 = arith.constant 5.000000e-01 : f32
    %12 = vector.broadcast %cst_7 : f32 to vector<16x512xf32>
    %13 = arith.mulf %12, %5 : vector<16x512xf32>
    %14 = math.tanh %11 : vector<16x512xf32>
    %cst_8 = arith.constant 1.000000e+00 : f32
    %15 = vector.broadcast %cst_8 : f32 to vector<16x512xf32>
    %16 = arith.addf %15, %14 : vector<16x512xf32>
    %17 = arith.mulf %13, %16 : vector<16x512xf32>
    %c0_9 = arith.constant 0 : index
    %c0_10 = arith.constant 0 : index
    %18 = vector.load %arg4[%c0_9, %c0_10] : memref<512x128xf32, #tpu.memory_space<vmem>>, vector<512x128xf32>
    %cst_11 = arith.constant dense<0.000000e+00> : vector<16x128xf32>
    %19 = tpu.matmul %17, %18, %cst_11 {dimension_numbers = #tpu.dot_dimension_numbers<[1], [0], [0], [1], [0, 0, 1, 1], [], []>} : vector<16x512xf32>, vector<512x128xf32>, vector<16x128xf32> -> vector<16x128xf32>
    %c0_12 = arith.constant 0 : index
    %c0_13 = arith.constant 0 : index
    %20 = vector.load %arg5[%c0_12, %c0_13] : memref<1x128xf32, #tpu.memory_space<vmem>>, vector<1x128xf32>
    %21 = vector.broadcast %20 : vector<1x128xf32> to vector<16x128xf32>
    %22 = arith.addf %19, %21 : vector<16x128xf32>
    %c0_14 = arith.constant 0 : index
    %c0_15 = arith.constant 0 : index
    %23 = vector.load %arg6[%c0_14, %c0_15] : memref<16x128xf32, #tpu.memory_space<vmem>>, vector<16x128xf32>
    tpu.vector_store %arg6[%c0_14, %c0_15], %22 {strides = array<i32>} : memref<16x128xf32, #tpu.memory_space<vmem>>, vector<16x128xf32>,
    return
  }
  func.func @transform_0(%arg0: i32) -> (i32, i32) {
    %c0_i32 = arith.constant 0 : i32
    %c0_i32_0 = arith.constant 0 : i32
    return %arg0, %c0_i32 : i32, i32
  }
  func.func @transform_1(%arg0: i32) -> (i32, i32) {
    %c0_i32 = arith.constant 0 : i32
    %c0_i32_0 = arith.constant 0 : i32
    %c0_i32_1 = arith.constant 0 : i32
    return %c0_i32, %c0_i32_0 : i32, i32
  }
  func.func @transform_2(%arg0: i32) -> (i32, i32) {
    %c0_i32 = arith.constant 0 : i32
    %c0_i32_0 = arith.constant 0 : i32
    %c0_i32_1 = arith.constant 0 : i32
    return %c0_i32, %c0_i32_0 : i32, i32
  }
  func.func @transform_3(%arg0: i32) -> (i32, i32) {
    %c0_i32 = arith.constant 0 : i32
    %c0_i32_0 = arith.constant 0 : i32
    %c0_i32_1 = arith.constant 0 : i32
    return %c0_i32, %c0_i32_0 : i32, i32
  }
  func.func @transform_4(%arg0: i32) -> (i32, i32) {
    %c0_i32 = arith.constant 0 : i32
    %c0_i32_0 = arith.constant 0 : i32
    %c0_i32_1 = arith.constant 0 : i32
    return %c0_i32, %c0_i32_0 : i32, i32
  }
  func.func @transform_5(%arg0: i32) -> (i32, i32) {
    %c0_i32 = arith.constant 0 : i32
    %c0_i32_0 = arith.constant 0 : i32
    return %arg0, %c0_i32 : i32, i32
  }
}

</mosaic_0001>

<bundles_post_ra>
// kernel: tpu_custom_call.1
= control target key start
LH: loop header
LB: loop body
LE: loop exit
PB: predicated region body
PF: predicated region fallthrough
CT: control target
= control target key end

     0   :  { %10 = vsyncpa [#allocation3], 0  ;;  %s1063_s0 = inlined_call_operand.hbm [shape: f32[16,128], index: 0, kind: input, shape index: {}]   ;;  %s1064_s1 = inlined_call_operand.hbm [shape: f32[128,512], index: 1, kind: input, shape index: {}]   ;;  %s1065_s2 = inlined_call_operand.vmem [shape: f32[1,512], index: 2, kind: input, shape index: {}]   ;;  %s1066_s3 = inlined_call_operand.hbm [shape: f32[512,128], index: 3, kind: input, shape index: {}]   ;;  %s1067_s4 = inlined_call_operand.vmem [shape: f32[1,128], index: 4, kind: input, shape index: {}]   ;;  %s1068_s5 = inlined_call_operand.hbm [shape: f32[16,128], index: 5, kind: output, shape index: {}]  }
   0x1   :  { %11 = vsyncpa [#allocation6], 0 }
   0x2   :  { %12 = vsyncpa [#allocation4], 0  ;;  %s933_s18 = smov [#allocation5]   ;;  %s839_s22 = scalar_lea.hbm %s1064_s1, 8192 }
   0x3   :  { %s30_s19 = sshll.u32 %s933_s18, 4  ;;  %p840_p0 = scmp.ne.s32.totalorder %s1064_s1, %s839_s22  ;;  %s31_s19 = int_to_ptr.vmem [resolvable:$true] %s30_s19 }
   0x4   :  { %p843_p1 = scmp.lt.u32.totalorder %s839_s22, %s1064_s1 }
   0x6   :  { %p845_p2 = pnand %p843_p1, %p840_p0 }
   0x8   :  { %848 = shalt.err (!%p845_p2)
}
   0x9   :  { %s849_s27 = scalar_lea.vmem %s31_s19, 8192  ;;  %p854_p4 = scmp.lt.s32.totalorder %s31_s19, %s31_s19 }
   0xa   :  { %p850_p3 = scmp.ne.s32.totalorder %s31_s19, %s849_s27  ;;  %p855_p5 = scmp.lt.s32.totalorder %s849_s27, %s849_s27 }
   0xc   :  { %p856_p6 = por %p855_p5, %p854_p4 }
   0xe   :  { %p857_p7 = pnand %p856_p6, %p850_p3 }
  0x10   :  { %860 = shalt.err (!%p857_p7)
}
  0x11   :  { %s934_s28 = smov 512   ;;  %s935_s29 = smov 32  }
  0x12   :  { %36 = dma.hbm_to_vmem [thread:$0]  %s1064_s1, 8192, %s31_s19, [#allocation6], %s934_s28, %s934_s28, %s935_s29  }
  0x13   :  { %s936_s7 = smov [#allocation2]   ;;  %s861_s11 = scalar_lea.hbm %s1063_s0, 256 }
  0x14   :  { %s18_s8 = sshll.u32 %s936_s7, 4  ;;  %p862_p8 = scmp.ne.s32.totalorder %s1063_s0, %s861_s11  ;;  %s19_s8 = int_to_ptr.vmem [resolvable:$true] %s18_s8 }
  0x15   :  { %p865_p9 = scmp.lt.u32.totalorder %s861_s11, %s1063_s0 }
  0x17   :  { %p867_p10 = pnand %p865_p9, %p862_p8 }
  0x19   :  { %870 = shalt.err (!%p867_p10)
}
  0x1a   :  { %s871_s16 = scalar_lea.vmem %s19_s8, 256  ;;  %p876_p12 = scmp.lt.s32.totalorder %s19_s8, %s19_s8 }
  0x1b   :  { %p872_p11 = scmp.ne.s32.totalorder %s19_s8, %s871_s16  ;;  %p877_p13 = scmp.lt.s32.totalorder %s871_s16, %s871_s16 }
  0x1d   :  { %p878_p0 = por %p877_p13, %p876_p12 }
  0x1f   :  { %p879_p1 = pnand %p878_p0, %p872_p11 }
  0x21   :  { %882 = shalt.err (!%p879_p1)
}
  0x22   :  { %s937_s1 = smov 128   ;;  %s938_s17 = smov 8  }
  0x23   :  { %24 = dma.hbm_to_vmem [thread:$0]  %s1063_s0, 256, %s19_s8, [#allocation3], %s937_s1, %s937_s1, %s938_s17  }
  0x24   :  { %s939_s20 = smov [#allocation7]   ;;  %s883_s24 = scalar_lea.hbm %s1066_s3, 8192 }
  0x25   :  { %s44_s21 = sshll.u32 %s939_s20, 4  ;;  %p884_p2 = scmp.ne.s32.totalorder %s1066_s3, %s883_s24  ;;  %s45_s21 = int_to_ptr.vmem [resolvable:$true] %s44_s21 }
  0x26   :  { %p887_p3 = scmp.lt.u32.totalorder %s883_s24, %s1066_s3 }
  0x28   :  { %p889_p4 = pnand %p887_p3, %p884_p2 }
  0x2a   :  { %892 = shalt.err (!%p889_p4)
}
  0x2b   :  { %s893_s29 = scalar_lea.vmem %s45_s21, 8192  ;;  %p898_p6 = scmp.lt.s32.totalorder %s45_s21, %s45_s21 }
  0x2c   :  { %p894_p5 = scmp.ne.s32.totalorder %s45_s21, %s893_s29  ;;  %p899_p7 = scmp.lt.s32.totalorder %s893_s29, %s893_s29 }
  0x2e   :  { %p900_p8 = por %p899_p7, %p898_p6 }
  0x30   :  { %p901_p9 = pnand %p900_p8, %p894_p5 }
  0x32   :  { %904 = shalt.err (!%p901_p9)
}
  0x33   :  { %50 = dma.hbm_to_vmem [thread:$0]  %s1066_s3, 8192, %s45_s21, [#allocation6], %s937_s1, %s937_s1, %s938_s17  }
  0x34   :  { %927 = dma.done.wait [#allocation3], 256  }
  0x35   :  { %928 = vsyncadd [#allocation3], 4294967040 }
  0x36   :  { %929 = dma.done.wait [#allocation6], 16384  }
  0x37   :  { %930 = vsyncadd [#allocation6], 4294950912  ;;  %v940_v0 = vmov 0.0   ;;  %v65_v1 = vld [vmem:[#allocation5 + $0x8] sm:$0xff]  ;;  %v67_v3 = vld [vmem:[#allocation5 + $0x18] sm:$0xff]  ;;  %s941_s8 = smov [#allocation8]  }
  0x38   :  { %214 = vmatprep.mubr.f32.mxu0 %v940_v0  ;;  %291 = vmatprep.mubr.f32.mxu1 %v940_v0  ;;  %v69_v2 = vld [vmem:[#allocation5 + $0x28] sm:$0xff]  ;;  %v71_v5 = vld [vmem:[#allocation5 + $0x38] sm:$0xff]  ;;  %v64_v6 = vld [vmem:[#allocation5] sm:$0xff]  ;;  %s596_s9 = sshll.u32 %s941_s8, 4  ;;  %s597_s9 = int_to_ptr.vmem [resolvable:$true] %s596_s9 }
  0x39   :  { %v686_v4 = vpack.c.bf16 %v69_v2, %v65_v1  ;;  %v68_v7 = vld [vmem:[#allocation5 + $0x20] sm:$0xff]  ;;  %v718_v8 = vpack.c.bf16 %v71_v5, %v67_v3  ;;  %v66_v10 = vld [vmem:[#allocation5 + $0x10] sm:$0xff]  ;;  %v73_v12 = vld [vmem:[#allocation5 + $0x48] sm:$0xff]  ;;  %p910_p11 = scmp.lt.s32.totalorder %s597_s9, %s597_s9 }
  0x3a   :  { %v688_v9 = vpack.c.bf16 %v68_v7, %v64_v6  ;;  %v70_v11 = vld [vmem:[#allocation5 + $0x30] sm:$0xff]  ;;  %v77_v14 = vld [vmem:[#allocation5 + $0x68] sm:$0xff]  ;;  %v75_v15 = vld [vmem:[#allocation5 + $0x58] sm:$0xff] }
  0x3b   :  { %687 = vmatprep.subr.bf16.mxu0 %v686_v4  ;;  %v720_v13 = vpack.c.bf16 %v70_v11, %v66_v10  ;;  %v79_v16 = vld [vmem:[#allocation5 + $0x78] sm:$0xff]  ;;  %719 = vmatprep.subr.bf16.mxu1 %v718_v8  ;;  %v690_v17 = vpack.c.bf16 %v77_v14, %v73_v12  ;;  %v72_v19 = vld [vmem:[#allocation5 + $0x40] sm:$0xff]  ;;  %v74_v21 = vld [vmem:[#allocation5 + $0x50] sm:$0xff] }
  0x3c   :  { %689 = vmatpush1.bf16.msra.mxu0 %v688_v9  ;;  %v722_v18 = vpack.c.bf16 %v79_v16, %v75_v15  ;;  %v76_v20 = vld [vmem:[#allocation5 + $0x60] sm:$0xff]  ;;  %v78_v23 = vld [vmem:[#allocation5 + $0x70] sm:$0xff]  ;;  %v81_v24 = vld [vmem:[#allocation5 + $0x88] sm:$0xff] }
  0x3d   :  { %721 = vmatpush1.bf16.msra.mxu1 %v720_v13  ;;  %v692_v22 = vpack.c.bf16 %v76_v20, %v72_v19  ;;  %v85_v25 = vld [vmem:[#allocation5 + $0xa8] sm:$0xff]  ;;  %691 = vmatprep.subr.bf16.mxu0 %v690_v17  ;;  %v724_v26 = vpack.c.bf16 %v78_v23, %v74_v21  ;;  %v83_v28 = vld [vmem:[#allocation5 + $0x98] sm:$0xff]  ;;  %v80_v30 = vld [vmem:[#allocation5 + $0x80] sm:$0xff] }
  0x3e   :  { %723 = vmatprep.subr.bf16.mxu1 %v722_v18  ;;  %v694_v27 = vpack.c.bf16 %v85_v25, %v81_v24  ;;  %v87_v29 = vld [vmem:[#allocation5 + $0xb8] sm:$0xff]  ;;  %v84_v32 = vld [vmem:[#allocation5 + $0xa0] sm:$0xff]  ;;  %v82_v33 = vld [vmem:[#allocation5 + $0x90] sm:$0xff] }
  0x3f   :  { %v726_v31 = vpack.c.bf16 %v87_v29, %v83_v28  ;;  %v86_v34 = vld [vmem:[#allocation5 + $0xb0] sm:$0xff]  ;;  %v696_v35 = vpack.c.bf16 %v84_v32, %v80_v30  ;;  %v89_v36 = vld [vmem:[#allocation5 + $0xc8] sm:$0xff]  ;;  %v91_v38 = vld [vmem:[#allocation5 + $0xd8] sm:$0xff] }
  0x40   :  { %693 = vmatpush1.bf16.msra.mxu0 %v692_v22  ;;  %v93_v37 = vld [vmem:[#allocation5 + $0xe8] sm:$0xff]  ;;  %v728_v39 = vpack.c.bf16 %v86_v34, %v82_v33  ;;  %v95_v41 = vld [vmem:[#allocation5 + $0xf8] sm:$0xff]  ;;  %v88_v42 = vld [vmem:[#allocation5 + $0xc0] sm:$0xff] }
  0x41   :  { %725 = vmatpush1.bf16.msra.mxu1 %v724_v26  ;;  %695 = vmatprep.subr.bf16.mxu0 %v694_v27  ;;  %v698_v40 = vpack.c.bf16 %v93_v37, %v89_v36  ;;  %v92_v43 = vld [vmem:[#allocation5 + $0xe0] sm:$0xff]  ;;  %v730_v44 = vpack.c.bf16 %v95_v41, %v91_v38  ;;  %v90_v45 = vld [vmem:[#allocation5 + $0xd0] sm:$0xff]  ;;  %v97_v47 = vld [vmem:[#allocation5 + $0x108] sm:$0xff] }
  0x42   :  { %727 = vmatprep.subr.bf16.mxu1 %v726_v31  ;;  %v94_v46 = vld [vmem:[#allocation5 + $0xf0] sm:$0xff]  ;;  %v101_v48 = vld [vmem:[#allocation5 + $0x128] sm:$0xff]  ;;  %v99_v49 = vld [vmem:[#allocation5 + $0x118] sm:$0xff]  ;;  %v700_v51 = vpack.c.bf16 %v92_v43, %v88_v42 }
  0x43   :  { %v103_v50 = vld [vmem:[#allocation5 + $0x138] sm:$0xff]  ;;  %v732_v52 = vpack.c.bf16 %v94_v46, %v90_v45  ;;  %v702_v53 = vpack.c.bf16 %v101_v48, %v97_v47  ;;  %v96_v54 = vld [vmem:[#allocation5 + $0x100] sm:$0xff]  ;;  %v98_v56 = vld [vmem:[#allocation5 + $0x110] sm:$0xff] }
  0x44   :  { %697 = vmatpush1.bf16.msra.mxu0 %v696_v35  ;;  %v100_v55 = vld [vmem:[#allocation5 + $0x120] sm:$0xff]  ;;  %v734_v57 = vpack.c.bf16 %v103_v50, %v99_v49  ;;  %v102_v58 = vld [vmem:[#allocation5 + $0x130] sm:$0xff]  ;;  %v105_v59 = vld [vmem:[#allocation5 + $0x148] sm:$0xff] }
  0x45   :  { %729 = vmatpush1.bf16.msra.mxu1 %v728_v39  ;;  %699 = vmatprep.subr.bf16.mxu0 %v698_v40  ;;  %v109_v60 = vld [vmem:[#allocation5 + $0x168] sm:$0xff]  ;;  %v107_v61 = vld [vmem:[#allocation5 + $0x158] sm:$0xff]  ;;  %v704_v63 = vpack.c.bf16 %v100_v55, %v96_v54  ;;  %v736_v1 = vpack.c.bf16 %v102_v58, %v98_v56  ;;  %v104_v3 = vld [vmem:[#allocation5 + $0x140] sm:$0xff] }
  0x46   :  { %731 = vmatprep.subr.bf16.mxu1 %v730_v44  ;;  %v111_v62 = vld [vmem:[#allocation5 + $0x178] sm:$0xff]  ;;  %v706_v2 = vpack.c.bf16 %v109_v60, %v105_v59  ;;  %v108_v4 = vld [vmem:[#allocation5 + $0x160] sm:$0xff]  ;;  %v106_v5 = vld [vmem:[#allocation5 + $0x150] sm:$0xff] }
  0x47   :  { %v738_v6 = vpack.c.bf16 %v111_v62, %v107_v61  ;;  %v110_v7 = vld [vmem:[#allocation5 + $0x170] sm:$0xff]  ;;  %v113_v8 = vld [vmem:[#allocation5 + $0x188] sm:$0xff]  ;;  %v115_v10 = vld [vmem:[#allocation5 + $0x198] sm:$0xff]  ;;  %v708_v12 = vpack.c.bf16 %v108_v4, %v104_v3 }
  0x48   :  { %701 = vmatpush1.bf16.msra.mxu0 %v700_v51  ;;  %v117_v9 = vld [vmem:[#allocation5 + $0x1a8] sm:$0xff]  ;;  %v119_v11 = vld [vmem:[#allocation5 + $0x1b8] sm:$0xff]  ;;  %v740_v13 = vpack.c.bf16 %v110_v7, %v106_v5  ;;  %v112_v15 = vld [vmem:[#allocation5 + $0x180] sm:$0xff] }
  0x49   :  { %733 = vmatpush1.bf16.msra.mxu1 %v732_v52  ;;  %703 = vmatprep.subr.bf16.mxu0 %v702_v53  ;;  %v710_v14 = vpack.c.bf16 %v117_v9, %v113_v8  ;;  %v116_v16 = vld [vmem:[#allocation5 + $0x1a0] sm:$0xff]  ;;  %v114_v17 = vld [vmem:[#allocation5 + $0x190] sm:$0xff]  ;;  %v742_v18 = vpack.c.bf16 %v119_v11, %v115_v10  ;;  %v121_v20 = vld [vmem:[#allocation5 + $0x1c8] sm:$0xff] }
  0x4a   :  { %735 = vmatprep.subr.bf16.mxu1 %v734_v57  ;;  %v118_v19 = vld [vmem:[#allocation5 + $0x1b0] sm:$0xff]  ;;  %v125_v21 = vld [vmem:[#allocation5 + $0x1e8] sm:$0xff]  ;;  %v123_v22 = vld [vmem:[#allocation5 + $0x1d8] sm:$0xff]  ;;  %v712_v24 = vpack.c.bf16 %v116_v16, %v112_v15 }
  0x4b   :  { %v127_v23 = vld [vmem:[#allocation5 + $0x1f8] sm:$0xff]  ;;  %v744_v25 = vpack.c.bf16 %v118_v19, %v114_v17  ;;  %v714_v26 = vpack.c.bf16 %v125_v21, %v121_v20  ;;  %v120_v27 = vld [vmem:[#allocation5 + $0x1c0] sm:$0xff]  ;;  %v122_v29 = vld [vmem:[#allocation5 + $0x1d0] sm:$0xff] }
  0x4c   :  { %705 = vmatpush1.bf16.msra.mxu0 %v704_v63  ;;  %v124_v28 = vld [vmem:[#allocation5 + $0x1e0] sm:$0xff]  ;;  %v746_v30 = vpack.c.bf16 %v127_v23, %v123_v22  ;;  %v126_v31 = vld [vmem:[#allocation5 + $0x1f0] sm:$0xff]  ;;  %v385_v33 = vld [vmem:[#allocation7 + $0x88] sm:$0xff] }
  0x4d   :  { %737 = vmatpush1.bf16.msra.mxu1 %v736_v1  ;;  %707 = vmatprep.subr.bf16.mxu0 %v706_v2  ;;  %v384_v32 = vld [vmem:[#allocation7 + $0x80] sm:$0xff]  ;;  %v417_v35 = vld [vmem:[#allocation7 + $0x188] sm:$0xff]  ;;  %v716_v36 = vpack.c.bf16 %v124_v28, %v120_v27  ;;  %v748_v37 = vpack.c.bf16 %v126_v31, %v122_v29  ;;  %v62_v44 = vld [vmem:[#allocation2] sm:$0xff] }
  0x4e   :  { %739 = vmatprep.subr.bf16.mxu1 %v738_v6  ;;  %v416_v34 = vld [vmem:[#allocation7 + $0x180] sm:$0xff]  ;;  %v750_v38 = vpack.c.bf16 %v385_v33, %v384_v32  ;;  %v369_v41 = vld [vmem:[#allocation7 + $0x8] sm:$0xff]  ;;  %v63_v47 = vld [vmem:[#allocation2 + $0x8] sm:$0xff] }
  0x4f   :  { %v782_v39 = vpack.c.bf16 %v417_v35, %v416_v34  ;;  %v368_v40 = vld [vmem:[#allocation7] sm:$0xff]  ;;  %v401_v43 = vld [vmem:[#allocation7 + $0x108] sm:$0xff]  ;;  %v386_v48 = vld [vmem:[#allocation7 + $0x90] sm:$0xff] }
  0x50   :  { %709 = vmatpush1.bf16.msra.mxu0 %v708_v12  ;;  %v400_v42 = vld [vmem:[#allocation7 + $0x100] sm:$0xff]  ;;  %v752_v45 = vpack.c.bf16 %v369_v41, %v368_v40  ;;  %v387_v49 = vld [vmem:[#allocation7 + $0x98] sm:$0xff]  ;;  %v418_v50 = vld [vmem:[#allocation7 + $0x190] sm:$0xff] }
  0x51   :  { %741 = vmatpush1.bf16.msra.mxu1 %v740_v13  ;;  %711 = vmatprep.subr.bf16.mxu0 %v710_v14  ;;  %v784_v46 = vpack.c.bf16 %v401_v43, %v400_v42  ;;  %v754_v51 = vpack.c.bf16 %v387_v49, %v386_v48  ;;  %v419_v52 = vld [vmem:[#allocation7 + $0x198] sm:$0xff]  ;;  %v370_v54 = vld [vmem:[#allocation7 + $0x10] sm:$0xff]  ;;  %v389_v60 = vld [vmem:[#allocation7 + $0xa8] sm:$0xff] }
  0x52   :  { %743 = vmatprep.subr.bf16.mxu1 %v742_v18  ;;  %v786_v53 = vpack.c.bf16 %v419_v52, %v418_v50  ;;  %v371_v55 = vld [vmem:[#allocation7 + $0x18] sm:$0xff]  ;;  %v402_v56 = vld [vmem:[#allocation7 + $0x110] sm:$0xff]  ;;  %v420_v61 = vld [vmem:[#allocation7 + $0x1a0] sm:$0xff] }
  0x53   :  { %v756_v57 = vpack.c.bf16 %v371_v55, %v370_v54  ;;  %v403_v58 = vld [vmem:[#allocation7 + $0x118] sm:$0xff]  ;;  %v421_v63 = vld [vmem:[#allocation7 + $0x1a8] sm:$0xff]  ;;  %v372_v2 = vld [vmem:[#allocation7 + $0x20] sm:$0xff] }
  0x54   :  { %713 = vmatpush1.bf16.msra.mxu0 %v712_v24  ;;  %v788_v59 = vpack.c.bf16 %v403_v58, %v402_v56  ;;  %v790_v1 = vpack.c.bf16 %v421_v63, %v420_v61  ;;  %v373_v3 = vld [vmem:[#allocation7 + $0x28] sm:$0xff]  ;;  %v404_v4 = vld [vmem:[#allocation7 + $0x120] sm:$0xff]  ;;  %v390_v8 = vld [vmem:[#allocation7 + $0xb0] sm:$0xff] }
  0x55   :  { %745 = vmatpush1.bf16.msra.mxu1 %v744_v25  ;;  %715 = vmatprep.subr.bf16.mxu0 %v714_v26  ;;  %v760_v5 = vpack.c.bf16 %v373_v3, %v372_v2  ;;  %v405_v6 = vld [vmem:[#allocation7 + $0x128] sm:$0xff]  ;;  %v391_v9 = vld [vmem:[#allocation7 + $0xb8] sm:$0xff]  ;;  %v422_v10 = vld [vmem:[#allocation7 + $0x1b0] sm:$0xff] }
  0x56   :  { %747 = vmatprep.subr.bf16.mxu1 %v746_v30  ;;  %v792_v7 = vpack.c.bf16 %v405_v6, %v404_v4  ;;  %v762_v11 = vpack.c.bf16 %v391_v9, %v390_v8  ;;  %v423_v12 = vld [vmem:[#allocation7 + $0x1b8] sm:$0xff]  ;;  %v374_v13 = vld [vmem:[#allocation7 + $0x30] sm:$0xff]  ;;  %v392_v20 = vld [vmem:[#allocation7 + $0xc0] sm:$0xff]  ;;  %v130_v4 = vlaneseq }
  0x57   :  { %v375_v14 = vld [vmem:[#allocation7 + $0x38] sm:$0xff]  ;;  %v794_v15 = vpack.c.bf16 %v423_v12, %v422_v10  ;;  %v406_v17 = vld [vmem:[#allocation7 + $0x130] sm:$0xff]  ;;  %v393_v21 = vld [vmem:[#allocation7 + $0xc8] sm:$0xff] }
  0x58   :  { %717 = vmatpush1.bf16.msra.mxu0 %v716_v36  ;;  %v764_v16 = vpack.c.bf16 %v375_v14, %v374_v13  ;;  %v407_v18 = vld [vmem:[#allocation7 + $0x138] sm:$0xff]  ;;  %v424_v22 = vld [vmem:[#allocation7 + $0x1c0] sm:$0xff]  ;;  %v766_v23 = vpack.c.bf16 %v393_v21, %v392_v20  ;;  %v425_v24 = vld [vmem:[#allocation7 + $0x1c8] sm:$0xff] }
  0x59   :  { %749 = vmatpush1.bf16.msra.mxu1 %v748_v37  ;;  %751 = vmatprep.subr.bf16.mxu0 %v750_v38  ;;  %v796_v19 = vpack.c.bf16 %v407_v18, %v406_v17  ;;  %v376_v25 = vld [vmem:[#allocation7 + $0x40] sm:$0xff]  ;;  %v377_v26 = vld [vmem:[#allocation7 + $0x48] sm:$0xff]  ;;  %v798_v27 = vpack.c.bf16 %v425_v24, %v424_v22  ;;  %v394_v32 = vld [vmem:[#allocation7 + $0xd0] sm:$0xff] }
  0x5a   :  { %783 = vmatprep.subr.bf16.mxu1 %v782_v39  ;;  %v768_v28 = vpack.c.bf16 %v377_v26, %v376_v25  ;;  %v408_v29 = vld [vmem:[#allocation7 + $0x140] sm:$0xff]  ;;  %v409_v30 = vld [vmem:[#allocation7 + $0x148] sm:$0xff]  ;;  %v395_v33 = vld [vmem:[#allocation7 + $0xd8] sm:$0xff] }
  0x5b   :  { %215 = vmatmul.mubr.f32.vlgmr.msra.gmra.mrb[0].mxu0 %v62_v44  ;;  %v800_v31 = vpack.c.bf16 %v409_v30, %v408_v29  ;;  %v426_v34 = vld [vmem:[#allocation7 + $0x1d0] sm:$0xff]  ;;  %v770_v35 = vpack.c.bf16 %v395_v33, %v394_v32  ;;  %v427_v36 = vld [vmem:[#allocation7 + $0x1d8] sm:$0xff]  ;;  %v429_v48 = vld [vmem:[#allocation7 + $0x1e8] sm:$0xff] }
  0x5c   :  { %292 = vmatmul.mubr.f32.vlgmr.msra.gmra.mrb[0].mxu1 %v62_v44  ;;  %220 = vmatprep.mubr.f32.mxu0 %v940_v0  ;;  %v378_v37 = vld [vmem:[#allocation7 + $0x50] sm:$0xff]  ;;  %v379_v38 = vld [vmem:[#allocation7 + $0x58] sm:$0xff]  ;;  %v802_v39 = vpack.c.bf16 %v427_v36, %v426_v34  ;;  %v396_v44 = vld [vmem:[#allocation7 + $0xe0] sm:$0xff] }
  0x5d   :  { %297 = vmatprep.mubr.f32.mxu1 %v940_v0  ;;  %753 = vmatpush3.bf16.msra.mxu0 %v752_v45  ;;  %v388_v0 = vld [vmem:[#allocation7 + $0xa0] sm:$0xff]  ;;  %v772_v40 = vpack.c.bf16 %v379_v38, %v378_v37  ;;  %v410_v41 = vld [vmem:[#allocation7 + $0x150] sm:$0xff]  ;;  %v411_v42 = vld [vmem:[#allocation7 + $0x158] sm:$0xff] }
  0x5e   :  { %785 = vmatpush3.bf16.msra.mxu1 %v784_v46  ;;  %755 = vmatprep.subr.bf16.mxu0 %v754_v51  ;;  %v758_v62 = vpack.c.bf16 %v389_v60, %v388_v0  ;;  %v804_v43 = vpack.c.bf16 %v411_v42, %v410_v41  ;;  %v397_v45 = vld [vmem:[#allocation7 + $0xe8] sm:$0xff]  ;;  %v428_v46 = vld [vmem:[#allocation7 + $0x1e0] sm:$0xff]  ;;  %v398_v55 = vld [vmem:[#allocation7 + $0xf0] sm:$0xff] }
  0x5f   :  { %221 = vmatmul.mubr.f32.gmra.mrb[2].mxu0 %v63_v47  ;;  %787 = vmatprep.subr.bf16.mxu1 %v786_v53  ;;  %v380_v49 = vld [vmem:[#allocation7 + $0x60] sm:$0xff]  ;;  %v381_v50 = vld [vmem:[#allocation7 + $0x68] sm:$0xff]  ;;  %v806_v51 = vpack.c.bf16 %v429_v48, %v428_v46  ;;  %v430_v58 = vld [vmem:[#allocation7 + $0x1f0] sm:$0xff] }
  0x60   :  { %298 = vmatmul.mubr.f32.gmra.mrb[2].mxu1 %v63_v47  ;;  %v774_v47 = vpack.c.bf16 %v397_v45, %v396_v44  ;;  %v776_v52 = vpack.c.bf16 %v381_v50, %v380_v49  ;;  %v412_v53 = vld [vmem:[#allocation7 + $0x160] sm:$0xff]  ;;  %v413_v54 = vld [vmem:[#allocation7 + $0x168] sm:$0xff]  ;;  %v382_v61 = vld [vmem:[#allocation7 + $0x70] sm:$0xff] }
  0x61   :  { %757 = vmatpush3.bf16.msra.mxu0 %v756_v57  ;;  %v808_v56 = vpack.c.bf16 %v413_v54, %v412_v53  ;;  %v399_v57 = vld [vmem:[#allocation7 + $0xf8] sm:$0xff]  ;;  %v414_v63 = vld [vmem:[#allocation7 + $0x170] sm:$0xff] }
  0x62   :  { %789 = vmatpush3.bf16.msra.mxu1 %v788_v59  ;;  %759 = vmatprep.subr.bf16.mxu0 %v758_v62  ;;  %v431_v59 = vld [vmem:[#allocation7 + $0x1f8] sm:$0xff]  ;;  %v778_v0 = vpack.c.bf16 %v399_v57, %v398_v55 }
  0x63   :  { %791 = vmatprep.subr.bf16.mxu1 %v790_v1  ;;  %v810_v60 = vpack.c.bf16 %v431_v59, %v430_v58  ;;  %v383_v62 = vld [vmem:[#allocation7 + $0x78] sm:$0xff] }
  0x64   :  { %v780_v1 = vpack.c.bf16 %v383_v62, %v382_v61  ;;  %v415_v2 = vld [vmem:[#allocation7 + $0x178] sm:$0xff] }
  0x65   :  { %761 = vmatpush3.bf16.msra.mxu0 %v760_v5  ;;  %v812_v3 = vpack.c.bf16 %v415_v2, %v414_v63  ;;  %v131_v5 = vshrl.u32 %v130_v4, 7 }
  0x66   :  { %793 = vmatpush3.bf16.msra.mxu1 %v792_v7  ;;  %763 = vmatprep.subr.bf16.mxu0 %v762_v11  ;;  %v128_v7 = vld [vmem:[%s1065_s2] sm:$0xf] }
  0x67   :  { %795 = vmatprep.subr.bf16.mxu1 %v794_v15  ;;  %v132_v6 = vsub.s32 0, %v131_v5  ;;  %v140_v8 = vsub.s32 2, %v131_v5  ;;  %v136_v9 = vsub.s32 1, %v131_v5  ;;  %v144_v10 = vsub.s32 3, %v131_v5 }
  0x69   :  { %765 = vmatpush3.bf16.msra.mxu0 %v764_v16  ;;  %v133_v11 = vrot.slane %v128_v7, %v132_v6  ;;  %v141_v12 = vrot.slane %v128_v7, %v140_v8  ;;  %v137_v13 = vrot.slane %v128_v7, %v136_v9  ;;  %v145_v14 = vrot.slane %v128_v7, %v144_v10 }
  0x6a   :  { %797 = vmatpush3.bf16.msra.mxu1 %v796_v19  ;;  %767 = vmatprep.subr.bf16.mxu0 %v766_v23 }
  0x6b   :  { %799 = vmatprep.subr.bf16.mxu1 %v798_v27 }
  0x6d   :  { %769 = vmatpush3.bf16.msra.mxu0 %v768_v28 }
  0x6e   :  { %801 = vmatpush3.bf16.msra.mxu1 %v800_v31  ;;  %771 = vmatprep.subr.bf16.mxu0 %v770_v35 }
  0x6f   :  { %803 = vmatprep.subr.bf16.mxu1 %v802_v39 }
  0x71   :  { %773 = vmatpush3.bf16.msra.mxu0 %v772_v40 }
  0x72   :  { %805 = vmatpush3.bf16.msra.mxu1 %v804_v43  ;;  %775 = vmatprep.subr.bf16.mxu0 %v774_v47 }
  0x73   :  { %807 = vmatprep.subr.bf16.mxu1 %v806_v51 }
  0x75   :  { %777 = vmatpush3.bf16.msra.mxu0 %v776_v52 }
  0x76   :  { %809 = vmatpush3.bf16.msra.mxu1 %v808_v56  ;;  %779 = vmatprep.subr.bf16.mxu0 %v778_v0 }
  0x77   :  { %811 = vmatprep.subr.bf16.mxu1 %v810_v60 }
  0x79   :  { %781 = vmatpush3.bf16.msra.mxu0 %v780_v1 }
  0x7a   :  { %813 = vmatpush3.bf16.msra.mxu1 %v812_v3 }
 0x12e   :  { %v216_v15 = vpop.f32.mrb[0].mxu0 }
 0x12f   :  { %v1021_v16 = vadd.f32 %v216_v15, %v133_v11  ;;  %v293_v17 = vpop.f32.mrb[0].mxu1  ;;  %v218_v18 = vpop.f32.mrb[1].mxu0 }
 0x130   :  { %v1023_v19 = vadd.f32 %v293_v17, %v141_v12  ;;  %v219_v20 = vadd.f32 %v218_v18, %v137_v13  ;;  %v295_v21 = vpop.f32.mrb[1].mxu1 }
 0x131   :  { %v304_v22 = vmul.f32 %v1021_v16, %v1021_v16  ;;  %v296_v23 = vadd.f32 %v295_v21, %v145_v14  ;;  %v336_v8 = vmul.f32 0.5, %v1021_v16 }
 0x132   :  { %v306_v24 = vmul.f32 %v1023_v19, %v1023_v19  ;;  %v305_v25 = vmul.f32 %v219_v20, %v219_v20  ;;  %v222_v26 = vpop.f32.mrb[2].mxu0  ;;  %v337_v5 = vmul.f32 0.5, %v219_v20 }
 0x133   :  { %v312_v27 = vmul.f32 0.035677407, %v304_v22  ;;  %v307_v28 = vmul.f32 %v296_v23, %v296_v23  ;;  %v1029_v29 = vadd.f32 %v222_v26, %v133_v11  ;;  %v299_v30 = vpop.f32.mrb[2].mxu1  ;;  %v224_v31 = vpop.f32.mrb[3].mxu0  ;;  %v339_v9 = vmul.f32 0.5, %v296_v23 }
 0x134   :  { %v314_v32 = vmul.f32 0.035677407, %v306_v24  ;;  %v313_v33 = vmul.f32 0.035677407, %v305_v25  ;;  %v1031_v34 = vadd.f32 %v299_v30, %v141_v12  ;;  %v225_v35 = vadd.f32 %v224_v31, %v137_v13  ;;  %v301_v36 = vpop.f32.mrb[3].mxu1 }
 0x135   :  { %v320_v37 = vadd.f32 0.7978846, %v312_v27  ;;  %v315_v38 = vmul.f32 0.035677407, %v307_v28  ;;  %v308_v39 = vmul.f32 %v1029_v29, %v1029_v29  ;;  %v302_v54 = vadd.f32 %v301_v36, %v145_v14 }
 0x136   :  { %v322_v40 = vadd.f32 0.7978846, %v314_v32  ;;  %v321_v41 = vadd.f32 0.7978846, %v313_v33  ;;  %v310_v42 = vmul.f32 %v1031_v34, %v1031_v34  ;;  %v309_v46 = vmul.f32 %v225_v35, %v225_v35 }
 0x137   :  { %v328_v43 = vmul.f32 %v320_v37, %v1021_v16  ;;  %v323_v44 = vadd.f32 0.7978846, %v315_v38  ;;  %v316_v45 = vmul.f32 0.035677407, %v308_v39  ;;  %v311_v57 = vmul.f32 %v302_v54, %v302_v54 }
 0x138   :  { %v330_v47 = vmul.f32 %v322_v40, %v1023_v19  ;;  %v329_v48 = vmul.f32 %v321_v41, %v219_v20  ;;  %v318_v49 = vmul.f32 0.035677407, %v310_v42  ;;  %v317_v52 = vmul.f32 0.035677407, %v309_v46 }
 0x139   :  { %823 = vtanh.f32 %v328_v43  ;;  %v331_v50 = vmul.f32 %v323_v44, %v296_v23  ;;  %v324_v51 = vadd.f32 0.7978846, %v316_v45  ;;  %v319_v0 = vmul.f32 0.035677407, %v311_v57 }
 0x13a   :  { %825 = vtanh.f32 %v330_v47  ;;  %v326_v53 = vadd.f32 0.7978846, %v318_v49  ;;  %v325_v56 = vadd.f32 0.7978846, %v317_v52  ;;  %v338_v11 = vmul.f32 0.5, %v1023_v19 }
 0x13b   :  { %827 = vtanh.f32 %v329_v48  ;;  %v332_v55 = vmul.f32 %v324_v51, %v1029_v29  ;;  %v327_v60 = vadd.f32 0.7978846, %v319_v0  ;;  %v341_v21 = vmul.f32 0.5, %v225_v35 }
 0x13c   :  { %829 = vtanh.f32 %v331_v50  ;;  %v334_v58 = vmul.f32 %v326_v53, %v1031_v34  ;;  %v333_v59 = vmul.f32 %v325_v56, %v225_v35  ;;  %v340_v20 = vmul.f32 0.5, %v1029_v29  ;;  %v609_v29 = vld [vmem:[%s1067_s4] ss:$0 sm:$0xff]  ;;  %s905_s4 = scalar_lea.vmem %s597_s9, 256 }
 0x13d   :  { %831 = vtanh.f32 %v332_v55  ;;  %v335_v61 = vmul.f32 %v327_v60, %v302_v54  ;;  %v343_v26 = vmul.f32 0.5, %v302_v54  ;;  %v342_v28 = vmul.f32 0.5, %v1031_v34  ;;  %p906_p10 = scmp.ne.s32.totalorder %s597_s9, %s905_s4  ;;  %p911_p12 = scmp.lt.s32.totalorder %s905_s4, %s905_s4 }
 0x13e   :  { %833 = vtanh.f32 %v333_v59 }
 0x13f   :  { %835 = vtanh.f32 %v334_v58  ;;  %p912_p13 = por %p911_p12, %p910_p11 }
 0x140   :  { %837 = vtanh.f32 %v335_v61 }
 0x141   :  { %p913_p0 = pnand %p912_p13, %p906_p10 }
 0x143   :  { %v824_v62 = vpop.eup %823 }
 0x144   :  { %v826_v63 = vpop.eup %825  ;;  %v352_v2 = vadd.f32 1.0, %v824_v62 }
 0x145   :  { %v828_v1 = vpop.eup %827  ;;  %v354_v4 = vadd.f32 1.0, %v826_v63 }
 0x146   :  { %v830_v3 = vpop.eup %829  ;;  %v353_v6 = vadd.f32 1.0, %v828_v1  ;;  %v360_v14 = vmul.f32 %v352_v2, %v336_v8 }
 0x147   :  { %v832_v7 = vpop.eup %831  ;;  %v355_v10 = vadd.f32 1.0, %v830_v3  ;;  %v362_v18 = vmul.f32 %v354_v4, %v338_v11 }
 0x148   :  { %v361_v12 = vmul.f32 %v353_v6, %v337_v5  ;;  %v834_v13 = vpop.eup %833  ;;  %v356_v17 = vadd.f32 1.0, %v832_v7 }
 0x149   :  { %v363_v15 = vmul.f32 %v355_v10, %v339_v9  ;;  %v357_v22 = vadd.f32 1.0, %v834_v13  ;;  %v836_v24 = vpop.eup %835 }
 0x14a   :  { %503 = vmatprep.mubr.f32.mxu0 %v361_v12  ;;  %v364_v23 = vmul.f32 %v356_v17, %v340_v20  ;;  %v838_v25 = vpop.eup %837  ;;  %v358_v19 = vadd.f32 1.0, %v836_v24 }
 0x14b   :  { %578 = vmatprep.mubr.f32.mxu1 %v363_v15  ;;  %504 = vmatmul.mubr.f32.vlgmr.msra.gmra.mrb[4].mxu0 %v360_v14  ;;  %v365_v16 = vmul.f32 %v357_v22, %v341_v21  ;;  %v359_v27 = vadd.f32 1.0, %v838_v25 }
 0x14c   :  { %579 = vmatmul.mubr.f32.vlgmr.msra.gmra.mrb[4].mxu1 %v362_v18  ;;  %v366_v31 = vmul.f32 %v358_v19, %v342_v28 }
 0x14d   :  { %508 = vmatprep.mubr.f32.mxu0 %v365_v16  ;;  %v367_v30 = vmul.f32 %v359_v27, %v343_v26 }
 0x14f   :  { %509 = vmatmul.mubr.f32.gmra.mrb[6].mxu0 %v364_v23  ;;  %583 = vmatprep.mubr.f32.mxu1 %v367_v30 }
 0x150   :  { %584 = vmatmul.mubr.f32.gmra.mrb[6].mxu1 %v366_v31 }
 0x21e   :  { %v642_v32 = vpop.f32.mrb[4].mxu0 }
 0x21f   :  { %v680_v33 = vpop.f32.mrb[4].mxu1  ;;  %v643_v35 = vpop.f32.mrb[5].mxu0 }
 0x220   :  { %v644_v36 = vadd.f32 %v643_v35, %v642_v32  ;;  %v681_v37 = vpop.f32.mrb[5].mxu1 }
 0x221   :  { %v682_v38 = vadd.f32 %v681_v37, %v680_v33 }
 0x222   :  { %v506_v39 = vadd.f32 %v644_v36, %v609_v29  ;;  %v645_v40 = vpop.f32.mrb[6].mxu0 }
 0x223   :  { %v646_v41 = vpop.f32.mrb[7].mxu0  ;;  %v683_v34 = vpop.f32.mrb[6].mxu1 }
 0x224   :  { %v581_v42 = vadd.f32 %v682_v38, %v506_v39  ;;  %v647_v43 = vadd.f32 %v646_v41, %v645_v40  ;;  %v684_v45 = vpop.f32.mrb[7].mxu1 }
 0x225   :  { %v685_v46 = vadd.f32 %v684_v45, %v683_v34 }
 0x226   :  { %589 = vst [vmem:[#allocation8] sm:$0xff] %v581_v42  ;;  %v511_v44 = vadd.f32 %v647_v43, %v609_v29 }
 0x228   :  { %v586_v47 = vadd.f32 %v685_v46, %v511_v44 }
 0x22a   :  { %590 = vst [vmem:[#allocation8 + $0x8] sm:$0xff] %v586_v47 }
 0x22b   :  { %916 = shalt.err (!%p913_p0)
}
 0x22c   :  { %s917_s12 = scalar_lea.hbm %s1068_s5, 256 }
 0x22d   :  { %p918_p1 = scmp.ne.s32.totalorder %s1068_s5, %s917_s12  ;;  %p921_p2 = scmp.lt.u32.totalorder %s917_s12, %s1068_s5 }
 0x22f   :  { %p923_p3 = pnand %p921_p2, %p918_p1 }
 0x231   :  { %926 = shalt.err (!%p923_p3)
}
 0x232   :  { %602 = dma.vmem_to_hbm [thread:$0]  %s597_s9, 256, %s1068_s5, [#allocation4], %s937_s1, %s937_s1, %s938_s17  }
 0x233   :  { %931 = dma.done.wait [#allocation4], 256  }
 0x234   :  { %932 = vsyncadd [#allocation4], 4294967040 }
 0x235   :  { %606 = vsyncpa [#allocation3], 1 }
 0x236   :  { %607 = vsyncpa [#allocation6], 1 }
 0x237   :  { %608 = vsyncpa [#allocation4], 1 }

</bundles_post_ra>
